<compile_context>
chip_gen: v5e
topology: v5e:2x2
jax: 0.10.0
libtpu: 0.0.40
codegen_flags: <defaults>
</compile_context>

<pallas_src>
import functools

import jax
import jax.numpy as jnp
from jax.experimental import pallas as pl
from jax.experimental.pallas import tpu as pltpu

LANE = 128
SUBLANE = 8


def _round_up(x, m):
    return (x + m - 1) // m * m


def _grid_parallelism():
    """2 on dual-TensorCore chips (v7x) so the batch axis can shard, else 1."""
    try:
        kind = (jax.devices()[0].device_kind or "").lower()
    except Exception:
        return 1
    return 2 if "v7" in kind else 1


def _mlp_kernel(x_ref, w1_ref, b1_ref, w2_ref, b2_ref, o_ref):
    # Layer 1: bf16 operands on the MXU, f32 accumulate; bias + ReLU in f32.
    # All lane dims are padded to 128 -> full unmasked vregs throughout.
    h = jnp.dot(x_ref[...], w1_ref[...], preferred_element_type=jnp.float32)
    h = jnp.maximum(h + b1_ref[...], 0.0)
    # Layer 2: cast activation to bf16 for the MXU, f32 accumulate, f32 bias,
    # lane-dense padded store (single unmasked vst stream).
    out = jnp.dot(h.astype(w2_ref.dtype), w2_ref[...],
                  preferred_element_type=jnp.float32)
    o_ref[...] = (out + b2_ref[...]).astype(o_ref.dtype)


def prepare_params(w1_t, b1, w2_t, b2):
    """One-time pad + cast of parameters (hoisted out of the per-call path).

    w1_t: (input_dim, fc1_dim); b1: (1, fc1_dim);
    w2_t: (fc1_dim, n_action);  b2: (1, n_action).
    Returns ((w1_p, b1_p, w2_p, b2_p), n_action) with fc1 and n_action padded
    to 128 lanes, weights in bf16, biases in f32.
    """
    input_dim, fc1_dim = w1_t.shape
    fc1_dim2, n_action = w2_t.shape
    assert fc1_dim == fc1_dim2
    fc1_pad = _round_up(fc1_dim, LANE)
    n_pad = _round_up(n_action, LANE)

    w1_p = jnp.pad(w1_t, ((0, 0), (0, fc1_pad - fc1_dim))).astype(jnp.bfloat16)
    b1_p = jnp.pad(b1, ((0, 0), (0, fc1_pad - fc1_dim))).astype(jnp.float32)
    w2_p = jnp.pad(w2_t, ((0, fc1_pad - fc1_dim),
                          (0, n_pad - n_action))).astype(jnp.bfloat16)
    b2_p = jnp.pad(b2, ((0, 0), (0, n_pad - n_action))).astype(jnp.float32)
    return (w1_p, b1_p, w2_p, b2_p), n_action


@functools.partial(jax.jit, static_argnames=("n_action", "block_b"))
def simple_mlp_forward(state, w1_p, b1_p, w2_p, b2_p, *, n_action, block_b=1024):
    """state: (B, input_dim) f32; padded params from prepare_params().
    Returns actions: (B, n_action) in state.dtype."""
    B, input_dim = state.shape
    fc1_pad, n_pad = w2_p.shape
    out_dtype = state.dtype

    # ---- batch tiling ------------------------------------------------------
    # Kernel is per-grid-step-overhead bound at these sizes: use the largest
    # tile that (a) covers the batch in one step on single-TC chips, (b) keeps
    # >= 2 steps on dual-TC chips so "parallel" shards across both cores,
    # (c) stays under block_b rows (VMEM is nowhere near a constraint).
    num_tc = _grid_parallelism()
    b_ceil = _round_up(B, SUBLANE)
    tb = min(block_b, _round_up(pl.cdiv(b_ceil, num_tc), SUBLANE))
    b_pad = _round_up(b_ceil, tb)
    grid = (b_pad // tb,)

    x = state if b_pad == B else jnp.pad(state, ((0, b_pad - B), (0, 0)))
    # bf16 MXU operand for the streamed activation tile (weights pre-cast).
    x_bf = x.astype(jnp.bfloat16)
    # NOTE: input_dim (K) is left unpadded; the (tb, input_dim) block equals
    # the full array width so it is legal, and padding K to 128 would 4x the
    # streamed x bytes for a kernel that is overhead-bound, not MXU-bound.

    itemsize_out = jnp.dtype(out_dtype).itemsize
    cost = pl.CostEstimate(
        flops=2 * b_pad * (input_dim * fc1_pad + fc1_pad * n_pad),
        transcendentals=0,
        bytes_accessed=(x_bf.size * 2 + w1_p.size * 2 + w2_p.size * 2
                        + b1_p.size * 4 + b2_p.size * 4
                        + b_pad * n_pad * itemsize_out),
    )

    out_padded = pl.pallas_call(
        _mlp_kernel,
        out_shape=jax.ShapeDtypeStruct((b_pad, n_pad), out_dtype),
        grid=grid,
        in_specs=[
            # streamed per batch tile (auto double-buffered)
            pl.BlockSpec((tb, input_dim), lambda i: (i, 0)),
            # weights / biases: constant index_map -> VMEM-resident, not re-DMA'd
            pl.BlockSpec((input_dim, fc1_pad), lambda i: (0, 0)),
            pl.BlockSpec((1, fc1_pad), lambda i: (0, 0)),
            pl.BlockSpec((fc1_pad, n_pad), lambda i: (0, 0)),
            pl.BlockSpec((1, n_pad), lambda i: (0, 0)),
        ],
        out_specs=pl.BlockSpec((tb, n_pad), lambda i: (i, 0)),
        compiler_params=pltpu.CompilerParams(
            dimension_semantics=("parallel",)),
        cost_estimate=cost,
    )(x_bf, w1_p, b1_p, w2_p, b2_p)

    # Strip batch padding and the lane padding of the output.
    # TODO(synk): for very large B, store/return bf16 to halve the padded
    # output writeback stream (not worth it at these sizes).
    return out_padded[:B, :n_action]


def init_params(key, input_dim, fc1_dim, n_action, dtype=jnp.float32):
    """PyTorch nn.Linear default init: U(-1/sqrt(fan_in), 1/sqrt(fan_in))."""
    k1, k2, k3, k4 = jax.random.split(key, 4)
    bound1 = 1.0 / (input_dim ** 0.5)
    bound2 = 1.0 / (fc1_dim ** 0.5)
    # Stored (in, out) = transpose of PyTorch's (out, in) layout.
    w1_t = jax.random.uniform(k1, (input_dim, fc1_dim), dtype, -bound1, bound1)
    b1 = jax.random.uniform(k2, (1, fc1_dim), dtype, -bound1, bound1)
    w2_t = jax.random.uniform(k3, (fc1_dim, n_action), dtype, -bound2, bound2)
    b2 = jax.random.uniform(k4, (1, n_action), dtype, -bound2, bound2)
    return w1_t, b1, w2_t, b2


if __name__ == "__main__":
    # Batch large enough to exercise tiling; feature dims consistent with the
    # module's forward (state: (batch, input_dim)).
    batch, input_dim, fc1_dim, n_action = 512, 32, 64, 8

    key = jax.random.PRNGKey(0)
    k_state, k_params = jax.random.split(key)
    state = jax.random.normal(k_state, (batch, input_dim), jnp.float32)
    w1_t, b1, w2_t, b2 = init_params(k_params, input_dim, fc1_dim, n_action)

    # One-time parameter pad/cast (hoisted out of the hot path).
    (w1_p, b1_p, w2_p, b2_p), n_act = prepare_params(w1_t, b1, w2_t, b2)
    w1_p, b1_p, w2_p, b2_p = jax.block_until_ready((w1_p, b1_p, w2_p, b2_p))

    actions = simple_mlp_forward(state, w1_p, b1_p, w2_p, b2_p, n_action=n_act)
    actions = jax.block_until_ready(actions)
    assert actions.shape == (batch, n_action)

    # Reference 1: same bf16-operand / f32-accumulate math in plain JAX.
    h_ref = jnp.maximum(
        jnp.dot(state.astype(jnp.bfloat16), w1_t.astype(jnp.bfloat16),
                preferred_element_type=jnp.float32) + b1, 0.0)
    ref_bf16 = jnp.dot(h_ref.astype(jnp.bfloat16), w2_t.astype(jnp.bfloat16),
                       preferred_element_type=jnp.float32) + b2
    assert jnp.allclose(actions, ref_bf16, atol=2e-3, rtol=2e-3)

    # Reference 2: full-f32 math (PyTorch module semantics), loose tolerance
    # to cover bf16 MXU operands.
    ref_f32 = jnp.maximum(state @ w1_t + b1, 0.0) @ w2_t + b2
    assert jnp.allclose(actions, ref_f32, atol=6e-2, rtol=6e-2)

    print("KERNEL_OK")
</pallas_src>

<mosaic_0001>
module attributes {stable_mosaic.version = 11 : i64} {
  func.func @_mlp_kernel(%arg0: i32, %arg1: memref<512x32xbf16, #tpu.memory_space<vmem>>, %arg2: memref<32x128xbf16, #tpu.memory_space<vmem>>, %arg3: memref<1x128xf32, #tpu.memory_space<vmem>>, %arg4: memref<128x128xbf16, #tpu.memory_space<vmem>>, %arg5: memref<1x128xf32, #tpu.memory_space<vmem>>, %arg6: memref<512x128xf32, #tpu.memory_space<vmem>>) attributes {dimension_semantics = [#tpu.dimension_semantics<parallel>], iteration_bounds = array<i64: 1>, scalar_prefetch = 0 : i64, scratch_operands = 0 : i64, tpu.core_type = #tpu.core_type<tc>, window_params = [{transform_indices = @transform_0, window_bounds = array<i64: 512, 32>}, {pipeline_mode = #tpu.pipeline_mode<synchronous>, transform_indices = @transform_1, window_bounds = array<i64: 32, 128>}, {pipeline_mode = #tpu.pipeline_mode<synchronous>, transform_indices = @transform_2, window_bounds = array<i64: 1, 128>}, {pipeline_mode = #tpu.pipeline_mode<synchronous>, transform_indices = @transform_3, window_bounds = array<i64: 128, 128>}, {pipeline_mode = #tpu.pipeline_mode<synchronous>, transform_indices = @transform_4, window_bounds = array<i64: 1, 128>}, {transform_indices = @transform_5, window_bounds = array<i64: 512, 128>}]} {
    %c0 = arith.constant 0 : index
    %c0_0 = arith.constant 0 : index
    %0 = vector.load %arg1[%c0, %c0_0] : memref<512x32xbf16, #tpu.memory_space<vmem>>, vector<512x32xbf16>
    %c0_1 = arith.constant 0 : index
    %c0_2 = arith.constant 0 : index
    %1 = vector.load %arg2[%c0_1, %c0_2] : memref<32x128xbf16, #tpu.memory_space<vmem>>, vector<32x128xbf16>
    %cst = arith.constant dense<0.000000e+00> : vector<512x128xf32>
    %2 = tpu.matmul %0, %1, %cst {dimension_numbers = #tpu.dot_dimension_numbers<[1], [0], [0], [1], [0, 0, 1, 1], [], []>} : vector<512x32xbf16>, vector<32x128xbf16>, vector<512x128xf32> -> vector<512x128xf32>
    %c0_3 = arith.constant 0 : index
    %c0_4 = arith.constant 0 : index
    %3 = vector.load %arg3[%c0_3, %c0_4] : memref<1x128xf32, #tpu.memory_space<vmem>>, vector<1x128xf32>
    %4 = vector.broadcast %3 : vector<1x128xf32> to vector<512x128xf32>
    %5 = arith.addf %2, %4 : vector<512x128xf32>
    %cst_5 = arith.constant 0.000000e+00 : f32
    %6 = vector.broadcast %cst_5 : f32 to vector<512x128xf32>
    %7 = arith.maximumf %5, %6 : vector<512x128xf32>
    %8 = arith.truncf %7 : vector<512x128xf32> to vector<512x128xbf16>
    %c0_6 = arith.constant 0 : index
    %c0_7 = arith.constant 0 : index
    %9 = vector.load %arg4[%c0_6, %c0_7] : memref<128x128xbf16, #tpu.memory_space<vmem>>, vector<128x128xbf16>
    %cst_8 = arith.constant dense<0.000000e+00> : vector<512x128xf32>
    %10 = tpu.matmul %8, %9, %cst_8 {dimension_numbers = #tpu.dot_dimension_numbers<[1], [0], [0], [1], [0, 0, 1, 1], [], []>} : vector<512x128xbf16>, vector<128x128xbf16>, vector<512x128xf32> -> vector<512x128xf32>
    %c0_9 = arith.constant 0 : index
    %c0_10 = arith.constant 0 : index
    %11 = vector.load %arg5[%c0_9, %c0_10] : memref<1x128xf32, #tpu.memory_space<vmem>>, vector<1x128xf32>
    %12 = vector.broadcast %11 : vector<1x128xf32> to vector<512x128xf32>
    %13 = arith.addf %10, %12 : vector<512x128xf32>
    %c0_11 = arith.constant 0 : index
    %c0_12 = arith.constant 0 : index
    %14 = vector.load %arg6[%c0_11, %c0_12] : memref<512x128xf32, #tpu.memory_space<vmem>>, vector<512x128xf32>
    tpu.vector_store %arg6[%c0_11, %c0_12], %13 {strides = array<i32>} : memref<512x128xf32, #tpu.memory_space<vmem>>, vector<512x128xf32>,
    return
  }
  func.func @transform_0(%arg0: i32) -> (i32, i32) {
    %c0_i32 = arith.constant 0 : i32
    %c0_i32_0 = arith.constant 0 : i32
    return %arg0, %c0_i32 : i32, i32
  }
  func.func @transform_1(%arg0: i32) -> (i32, i32) {
    %c0_i32 = arith.constant 0 : i32
    %c0_i32_0 = arith.constant 0 : i32
    %c0_i32_1 = arith.constant 0 : i32
    return %c0_i32, %c0_i32_0 : i32, i32
  }
  func.func @transform_2(%arg0: i32) -> (i32, i32) {
    %c0_i32 = arith.constant 0 : i32
    %c0_i32_0 = arith.constant 0 : i32
    %c0_i32_1 = arith.constant 0 : i32
    return %c0_i32, %c0_i32_0 : i32, i32
  }
  func.func @transform_3(%arg0: i32) -> (i32, i32) {
    %c0_i32 = arith.constant 0 : i32
    %c0_i32_0 = arith.constant 0 : i32
    %c0_i32_1 = arith.constant 0 : i32
    return %c0_i32, %c0_i32_0 : i32, i32
  }
  func.func @transform_4(%arg0: i32) -> (i32, i32) {
    %c0_i32 = arith.constant 0 : i32
    %c0_i32_0 = arith.constant 0 : i32
    %c0_i32_1 = arith.constant 0 : i32
    return %c0_i32, %c0_i32_0 : i32, i32
  }
  func.func @transform_5(%arg0: i32) -> (i32, i32) {
    %c0_i32 = arith.constant 0 : i32
    %c0_i32_0 = arith.constant 0 : i32
    return %arg0, %c0_i32 : i32, i32
  }
}

</mosaic_0001>

<bundles_post_ra>
// kernel: simple_mlp_forward.1
= control target key start
LH: loop header
LB: loop body
LE: loop exit
PB: predicated region body
PF: predicated region fallthrough
CT: control target
= control target key end

     0   :  { %vm265_vm0 = vcmask 261120   ;;  %s1704_s1 = inlined_call_operand.vmem [shape: bf16[32,128], index: 1, kind: input, shape index: {}]   ;;  %s1705_s2 = inlined_call_operand.vmem [shape: f32[1,128], index: 2, kind: input, shape index: {}]   ;;  %s1706_s0 = inlined_call_operand.vmem [shape: bf16[512,32], index: 0, kind: input, shape index: {}]   ;;  %s1707_s3 = inlined_call_operand.vmem [shape: bf16[128,128], index: 3, kind: input, shape index: {}]   ;;  %s1708_s4 = inlined_call_operand.vmem [shape: f32[1,128], index: 4, kind: input, shape index: {}]   ;;  %s1709_s5 = inlined_call_operand.vmem [shape: f32[512,128], index: 5, kind: output, shape index: {}]  }
   0x1   :  { %v1165_v0 = vld [vmem:[%s1704_s1 + $0x8] sm:$0xff]  ;;  %v1164_v1 = vld [vmem:[%s1704_s1] sm:$0xff]  ;;  %v1134_v4 = vld [vmem:[%s1706_s0 + $0x10] sm:$0xff] }
   0x2   :  { %368 = vmatpush.bf16.msra.mxu0 %v1165_v0  ;;  %1174 = vmatpush.bf16.msra.mxu3 %v1165_v0  ;;  %v1132_v2 = vld [vmem:[%s1706_s0] sm:$0xff]  ;;  %v1133_v3 = vld [vmem:[%s1706_s0 + $0x8] sm:$0xff]  ;;  %v1135_v5 = vld [vmem:[%s1706_s0 + $0x18] sm:$0xff] }
   0x3   :  { %v1136_v6 = vld [vmem:[%s1706_s0 + $0x20] sm:$0xff]  ;;  %v1173_v7 = vld [vmem:[%s1707_s3 + $0x38] sm:$0xff]  ;;  %v1137_v8 = vld [vmem:[%s1706_s0 + $0x28] sm:$0xff] }
   0x4   :  { %695 = vmatpush.bf16.msra.mxu1 %v1173_v7  ;;  %1176 = vmatpush.bf16.msra.mxu2 %v1173_v7  ;;  %v1172_v9 = vld [vmem:[%s1707_s3 + $0x30] sm:$0xff]  ;;  %v1171_v10 = vld [vmem:[%s1707_s3 + $0x28] sm:$0xff]  ;;  %v1170_v11 = vld [vmem:[%s1707_s3 + $0x20] sm:$0xff] }
   0x5   :  { %v1169_v12 = vld [vmem:[%s1707_s3 + $0x18] sm:$0xff]  ;;  %v1138_v13 = vld [vmem:[%s1706_s0 + $0x30] sm:$0xff]  ;;  %v1167_v15 = vld [vmem:[%s1707_s3 + $0x8] sm:$0xff] }
   0x6   :  { %369 = vmatpush.bf16.msra.mxu0 %v1164_v1  ;;  %1175 = vmatpush.bf16.msra.mxu3 %v1164_v1  ;;  %v1168_v14 = vld [vmem:[%s1707_s3 + $0x10] sm:$0xff]  ;;  %v1166_v16 = vld [vmem:[%s1707_s3] sm:$0xff]  ;;  %v1139_v17 = vld [vmem:[%s1706_s0 + $0x38] sm:$0xff] }
   0x7   :  { %v1140_v18 = vld [vmem:[%s1706_s0 + $0x40] sm:$0xff]  ;;  %v1141_v27 = vld [vmem:[%s1706_s0 + $0x48] sm:$0xff]  ;;  %v1142_v35 = vld [vmem:[%s1706_s0 + $0x50] sm:$0xff] }
   0x8   :  { %696 = vmatpush.bf16.msra.mxu1 %v1172_v9  ;;  %1177 = vmatpush.bf16.msra.mxu2 %v1172_v9  ;;  %v1284_v20 = vld [vmem:[%s1705_s2] ss:$0 sm:$0xff]  ;;  %v1143_v43 = vld [vmem:[%s1706_s0 + $0x58] sm:$0xff]  ;;  %v1145_v59 = vld [vmem:[%s1706_s0 + $0x68] sm:$0xff] }
   0x9   :  { %1068 = vmatmul.msk.bf16.vlgmr.msra.gmra.mxu0 %vm265_vm0, %v1132_v2  ;;  %v1144_v51 = vld [vmem:[%s1706_s0 + $0x60] sm:$0xff] }
   0xc   :  { %697 = vmatpush.bf16.msra.mxu1 %v1171_v10  ;;  %1178 = vmatpush.bf16.msra.mxu2 %v1171_v10 }
  0x10   :  { %698 = vmatpush.bf16.msra.mxu1 %v1170_v11  ;;  %1179 = vmatpush.bf16.msra.mxu2 %v1170_v11 }
  0x14   :  { %699 = vmatpush.bf16.msra.mxu1 %v1169_v12  ;;  %1180 = vmatpush.bf16.msra.mxu2 %v1169_v12  ;;  %v1147_v12 = vld [vmem:[%s1706_s0 + $0x78] sm:$0xff] }
  0x18   :  { %700 = vmatpush.bf16.msra.mxu1 %v1168_v14  ;;  %1181 = vmatpush.bf16.msra.mxu2 %v1168_v14  ;;  %v1150_v14 = vld [vmem:[%s1706_s0 + $0x90] sm:$0xff] }
  0x19   :  { %1069 = vmatmul.msk.bf16.gmra.mxu0 %vm265_vm0, %v1133_v3  ;;  %v1146_v3 = vld [vmem:[%s1706_s0 + $0x70] sm:$0xff] }
  0x1c   :  { %701 = vmatpush.bf16.msra.mxu1 %v1167_v15  ;;  %1182 = vmatpush.bf16.msra.mxu2 %v1167_v15 }
  0x20   :  { %702 = vmatpush.bf16.msra.mxu1 %v1166_v16  ;;  %1183 = vmatpush.bf16.msra.mxu2 %v1166_v16 }
  0x29   :  { %1070 = vmatmul.msk.bf16.gmra.mxu0 %vm265_vm0, %v1134_v4 }
  0x39   :  { %1071 = vmatmul.msk.bf16.gmra.mxu0 %vm265_vm0, %v1135_v5  ;;  %v1149_v5 = vld [vmem:[%s1706_s0 + $0x88] sm:$0xff] }
  0x3a   :  { %1085 = vmatmul.msk.bf16.vlgmr.msra.gmra.mxu3 %vm265_vm0, %v1149_v5 }
  0x49   :  { %1072 = vmatmul.msk.bf16.gmra.mxu0 %vm265_vm0, %v1136_v6 }
  0x4a   :  { %1086 = vmatmul.msk.bf16.gmra.mxu3 %vm265_vm0, %v1150_v14 }
  0x59   :  { %1073 = vmatmul.msk.bf16.gmra.mxu0 %vm265_vm0, %v1137_v8 }
  0x69   :  { %1074 = vmatmul.msk.bf16.gmra.mxu0 %vm265_vm0, %v1138_v13 }
  0x79   :  { %1075 = vmatmul.msk.bf16.gmra.mxu0 %vm265_vm0, %v1139_v17 }
  0x86   :  { %v371_v19 = vpop.f32.mrf.mxu0 }
  0x87   :  { %v372_v21 = vadd.f32 %v1284_v20, %v371_v19 }
  0x89   :  { %1076 = vmatmul.msk.bf16.gmra.mxu0 %vm265_vm0, %v1140_v18  ;;  %v531_v24 = vmax.f32 %v372_v21, 0.0 }
  0x8e   :  { %v373_v22 = vpop.f32.mrf.mxu0 }
  0x8f   :  { %v374_v23 = vadd.f32 %v1284_v20, %v373_v22  ;;  %v1148_v22 = vld [vmem:[%s1706_s0 + $0x80] sm:$0xff] }
  0x91   :  { %v532_v25 = vmax.f32 %v374_v23, 0.0 }
  0x93   :  { %v595_v26 = vpack.c.bf16 %v532_v25, %v531_v24  ;;  %v1151_v24 = vld [vmem:[%s1706_s0 + $0x98] sm:$0xff] }
  0x94   :  { %1087 = vmatmul.msk.bf16.gmra.mxu3 %vm265_vm0, %v1151_v24 }
  0x95   :  { %703 = vmatmul.bf16.vlgmr.msra.gmra.mxu1 %v595_v26 }
  0x96   :  { %v376_v28 = vpop.f32.mrf.mxu0 }
  0x97   :  { %v377_v29 = vadd.f32 %v1284_v20, %v376_v28  ;;  %v1352_v28 = vld [vmem:[%s1708_s4] ss:$0 sm:$0xff] }
  0x99   :  { %1077 = vmatmul.msk.bf16.gmra.mxu0 %vm265_vm0, %v1141_v27  ;;  %v533_v32 = vmax.f32 %v377_v29, 0.0 }
  0x9e   :  { %v378_v30 = vpop.f32.mrf.mxu0 }
  0x9f   :  { %v379_v31 = vadd.f32 %v1284_v20, %v378_v30 }
  0xa1   :  { %v534_v33 = vmax.f32 %v379_v31, 0.0 }
  0xa3   :  { %v596_v34 = vpack.c.bf16 %v534_v33, %v533_v32 }
  0xa5   :  { %708 = vmatmul.bf16.gmra.mxu1 %v596_v34 }
  0xa6   :  { %v381_v36 = vpop.f32.mrf.mxu0 }
  0xa7   :  { %v382_v37 = vadd.f32 %v1284_v20, %v381_v36 }
  0xa9   :  { %1078 = vmatmul.msk.bf16.gmra.mxu0 %vm265_vm0, %v1142_v35  ;;  %v535_v40 = vmax.f32 %v382_v37, 0.0  ;;  %v1152_v35 = vld [vmem:[%s1706_s0 + $0xa0] sm:$0xff] }
  0xaa   :  { %1088 = vmatmul.msk.bf16.gmra.mxu3 %vm265_vm0, %v1152_v35 }
  0xae   :  { %v383_v38 = vpop.f32.mrf.mxu0 }
  0xaf   :  { %v384_v39 = vadd.f32 %v1284_v20, %v383_v38 }
  0xb1   :  { %v536_v41 = vmax.f32 %v384_v39, 0.0 }
  0xb3   :  { %v597_v42 = vpack.c.bf16 %v536_v41, %v535_v40 }
  0xb5   :  { %713 = vmatmul.bf16.gmra.mxu1 %v597_v42 }
  0xb6   :  { %v386_v44 = vpop.f32.mrf.mxu0 }
  0xb7   :  { %v387_v45 = vadd.f32 %v1284_v20, %v386_v44 }
  0xb9   :  { %1079 = vmatmul.msk.bf16.gmra.mxu0 %vm265_vm0, %v1143_v43  ;;  %v537_v48 = vmax.f32 %v387_v45, 0.0 }
  0xbe   :  { %v388_v46 = vpop.f32.mrf.mxu0 }
  0xbf   :  { %v389_v47 = vadd.f32 %v1284_v20, %v388_v46 }
  0xc1   :  { %v538_v49 = vmax.f32 %v389_v47, 0.0  ;;  %v1153_v47 = vld [vmem:[%s1706_s0 + $0xa8] sm:$0xff] }
  0xc2   :  { %1089 = vmatmul.msk.bf16.gmra.mxu3 %vm265_vm0, %v1153_v47  ;;  %v1158_v47 = vld [vmem:[%s1706_s0 + $0xd0] sm:$0xff] }
  0xc3   :  { %v598_v50 = vpack.c.bf16 %v538_v49, %v537_v48 }
  0xc5   :  { %718 = vmatmul.bf16.gmra.mxu1 %v598_v50 }
  0xc6   :  { %v391_v52 = vpop.f32.mrf.mxu0 }
  0xc7   :  { %v392_v53 = vadd.f32 %v1284_v20, %v391_v52 }
  0xc9   :  { %1080 = vmatmul.msk.bf16.gmra.mxu0 %vm265_vm0, %v1144_v51  ;;  %v539_v56 = vmax.f32 %v392_v53, 0.0 }
  0xce   :  { %v393_v54 = vpop.f32.mrf.mxu0 }
  0xcf   :  { %v394_v55 = vadd.f32 %v1284_v20, %v393_v54 }
  0xd1   :  { %v540_v57 = vmax.f32 %v394_v55, 0.0 }
  0xd3   :  { %v599_v58 = vpack.c.bf16 %v540_v57, %v539_v56 }
  0xd5   :  { %723 = vmatmul.bf16.gmra.mxu1 %v599_v58 }
  0xd6   :  { %v396_v60 = vpop.f32.mrf.mxu0 }
  0xd7   :  { %v397_v61 = vadd.f32 %v1284_v20, %v396_v60 }
  0xd9   :  { %1081 = vmatmul.msk.bf16.gmra.mxu0 %vm265_vm0, %v1145_v59  ;;  %v541_v0 = vmax.f32 %v397_v61, 0.0  ;;  %v1154_v59 = vld [vmem:[%s1706_s0 + $0xb0] sm:$0xff] }
  0xda   :  { %1090 = vmatmul.msk.bf16.gmra.mxu3 %vm265_vm0, %v1154_v59 }
  0xde   :  { %v398_v62 = vpop.f32.mrf.mxu0 }
  0xdf   :  { %v399_v63 = vadd.f32 %v1284_v20, %v398_v62 }
  0xe1   :  { %v542_v1 = vmax.f32 %v399_v63, 0.0 }
  0xe3   :  { %v600_v2 = vpack.c.bf16 %v542_v1, %v541_v0 }
  0xe5   :  { %728 = vmatmul.bf16.gmra.mxu1 %v600_v2 }
  0xe6   :  { %v401_v4 = vpop.f32.mrf.mxu0 }
  0xe7   :  { %v402_v6 = vadd.f32 %v1284_v20, %v401_v4 }
  0xe9   :  { %1082 = vmatmul.msk.bf16.gmra.mxu0 %vm265_vm0, %v1146_v3  ;;  %v543_v9 = vmax.f32 %v402_v6, 0.0 }
  0xee   :  { %v403_v7 = vpop.f32.mrf.mxu0 }
  0xef   :  { %v404_v8 = vadd.f32 %v1284_v20, %v403_v7  ;;  %v1155_v7 = vld [vmem:[%s1706_s0 + $0xb8] sm:$0xff] }
  0xf0   :  { %1091 = vmatmul.msk.bf16.gmra.mxu3 %vm265_vm0, %v1155_v7 }
  0xf1   :  { %v544_v10 = vmax.f32 %v404_v8, 0.0 }
  0xf3   :  { %v601_v11 = vpack.c.bf16 %v544_v10, %v543_v9 }
  0xf5   :  { %733 = vmatmul.bf16.gmra.mxu1 %v601_v11 }
  0xf6   :  { %v406_v13 = vpop.f32.mrf.mxu0 }
  0xf7   :  { %v407_v15 = vadd.f32 %v1284_v20, %v406_v13 }
  0xf9   :  { %1083 = vmatmul.msk.bf16.gmra.mxu0 %vm265_vm0, %v1147_v12  ;;  %v545_v18 = vmax.f32 %v407_v15, 0.0 }
  0xfe   :  { %v408_v16 = vpop.f32.mrf.mxu0 }
  0xff   :  { %v409_v17 = vadd.f32 %v1284_v20, %v408_v16 }
 0x101   :  { %v546_v19 = vmax.f32 %v409_v17, 0.0 }
 0x103   :  { %v602_v21 = vpack.c.bf16 %v546_v19, %v545_v18  ;;  %v1156_v19 = vld [vmem:[%s1706_s0 + $0xc0] sm:$0xff] }
 0x104   :  { %1092 = vmatmul.msk.bf16.gmra.mxu3 %vm265_vm0, %v1156_v19 }
 0x105   :  { %738 = vmatmul.bf16.gmra.mxu1 %v602_v21 }
 0x106   :  { %v411_v23 = vpop.f32.mrf.mxu0 }
 0x107   :  { %v412_v25 = vadd.f32 %v1284_v20, %v411_v23 }
 0x109   :  { %1084 = vmatmul.msk.bf16.gmra.mxu0 %vm265_vm0, %v1148_v22  ;;  %v547_v29 = vmax.f32 %v412_v25, 0.0 }
 0x10e   :  { %v413_v26 = vpop.f32.mrf.mxu0 }
 0x10f   :  { %v414_v27 = vadd.f32 %v1284_v20, %v413_v26 }
 0x111   :  { %v548_v30 = vmax.f32 %v414_v27, 0.0 }
 0x112   :  { %v704_v31 = vpop.f32.mrf.mxu1 }
 0x113   :  { %v705_v32 = vadd.f32 %v1352_v28, %v704_v31  ;;  %v603_v33 = vpack.c.bf16 %v548_v30, %v547_v29 }
 0x115   :  { %864 = vst [vmem:[%s1709_s5] sm:$0xff] %v705_v32  ;;  %743 = vmatmul.bf16.gmra.mxu1 %v603_v33  ;;  %v1157_v33 = vld [vmem:[%s1706_s0 + $0xc8] sm:$0xff] }
 0x116   :  { %v416_v34 = vpop.f32.mrf.mxu0  ;;  %1093 = vmatmul.msk.bf16.gmra.mxu3 %vm265_vm0, %v1157_v33 }
 0x117   :  { %v417_v38 = vadd.f32 %v1284_v20, %v416_v34 }
 0x119   :  { %v549_v41 = vmax.f32 %v417_v38, 0.0  ;;  %v456_v38 = vpop.f32.mrf.mxu3 }
 0x11a   :  { %v706_v36 = vpop.f32.mrf.mxu1 }
 0x11b   :  { %v707_v37 = vadd.f32 %v1352_v28, %v706_v36 }
 0x11d   :  { %865 = vst [vmem:[%s1709_s5 + $0x8] sm:$0xff] %v707_v37 }
 0x11e   :  { %v418_v39 = vpop.f32.mrf.mxu0 }
 0x11f   :  { %v419_v40 = vadd.f32 %v1284_v20, %v418_v39 }
 0x121   :  { %v550_v42 = vmax.f32 %v419_v40, 0.0 }
 0x122   :  { %v709_v43 = vpop.f32.mrf.mxu1 }
 0x123   :  { %v710_v44 = vadd.f32 %v1352_v28, %v709_v43  ;;  %v604_v45 = vpack.c.bf16 %v550_v42, %v549_v41 }
 0x125   :  { %866 = vst [vmem:[%s1709_s5 + $0x10] sm:$0xff] %v710_v44  ;;  %748 = vmatmul.bf16.gmra.mxu1 %v604_v45 }
 0x126   :  { %v421_v46 = vpop.f32.mrf.mxu0  ;;  %1094 = vmatmul.msk.bf16.gmra.mxu3 %vm265_vm0, %v1158_v47 }
 0x127   :  { %v422_v50 = vadd.f32 %v1284_v20, %v421_v46  ;;  %v458_v46 = vpop.f32.mrf.mxu3 }
 0x129   :  { %v551_v53 = vmax.f32 %v422_v50, 0.0 }
 0x12a   :  { %v711_v48 = vpop.f32.mrf.mxu1 }
 0x12b   :  { %v712_v49 = vadd.f32 %v1352_v28, %v711_v48 }
 0x12d   :  { %867 = vst [vmem:[%s1709_s5 + $0x18] sm:$0xff] %v712_v49 }
 0x12e   :  { %v423_v51 = vpop.f32.mrf.mxu0 }
 0x12f   :  { %v424_v52 = vadd.f32 %v1284_v20, %v423_v51 }
 0x131   :  { %v552_v54 = vmax.f32 %v424_v52, 0.0  ;;  %v461_v52 = vpop.f32.mrf.mxu3 }
 0x132   :  { %v714_v55 = vpop.f32.mrf.mxu1 }
 0x133   :  { %v715_v56 = vadd.f32 %v1352_v28, %v714_v55  ;;  %v605_v57 = vpack.c.bf16 %v552_v54, %v551_v53 }
 0x135   :  { %868 = vst [vmem:[%s1709_s5 + $0x20] sm:$0xff] %v715_v56  ;;  %753 = vmatmul.bf16.gmra.mxu1 %v605_v57 }
 0x136   :  { %v426_v58 = vpop.f32.mrf.mxu0 }
 0x137   :  { %v427_v62 = vadd.f32 %v1284_v20, %v426_v58 }
 0x139   :  { %v553_v1 = vmax.f32 %v427_v62, 0.0 }
 0x13a   :  { %v716_v60 = vpop.f32.mrf.mxu1 }
 0x13b   :  { %v717_v61 = vadd.f32 %v1352_v28, %v716_v60  ;;  %v463_v60 = vpop.f32.mrf.mxu3 }
 0x13d   :  { %869 = vst [vmem:[%s1709_s5 + $0x28] sm:$0xff] %v717_v61  ;;  %v1159_v61 = vld [vmem:[%s1706_s0 + $0xd8] sm:$0xff] }
 0x13e   :  { %v428_v63 = vpop.f32.mrf.mxu0  ;;  %1095 = vmatmul.msk.bf16.gmra.mxu3 %vm265_vm0, %v1159_v61 }
 0x13f   :  { %v429_v0 = vadd.f32 %v1284_v20, %v428_v63 }
 0x141   :  { %v554_v2 = vmax.f32 %v429_v0, 0.0 }
 0x142   :  { %v719_v3 = vpop.f32.mrf.mxu1 }
 0x143   :  { %v720_v4 = vadd.f32 %v1352_v28, %v719_v3  ;;  %v606_v5 = vpack.c.bf16 %v554_v2, %v553_v1  ;;  %v466_v2 = vpop.f32.mrf.mxu3 }
 0x145   :  { %870 = vst [vmem:[%s1709_s5 + $0x30] sm:$0xff] %v720_v4  ;;  %758 = vmatmul.bf16.gmra.mxu1 %v606_v5 }
 0x146   :  { %v431_v6 = vpop.f32.mrf.mxu0 }
 0x147   :  { %v432_v10 = vadd.f32 %v1284_v20, %v431_v6 }
 0x149   :  { %v555_v13 = vmax.f32 %v432_v10, 0.0  ;;  %v1160_v10 = vld [vmem:[%s1706_s0 + $0xe0] sm:$0xff] }
 0x14a   :  { %v721_v8 = vpop.f32.mrf.mxu1 }
 0x14b   :  { %v722_v9 = vadd.f32 %v1352_v28, %v721_v8 }
 0x14d   :  { %871 = vst [vmem:[%s1709_s5 + $0x38] sm:$0xff] %v722_v9  ;;  %v468_v9 = vpop.f32.mrf.mxu3 }
 0x14e   :  { %v433_v11 = vpop.f32.mrf.mxu0  ;;  %1096 = vmatmul.msk.bf16.gmra.mxu3 %vm265_vm0, %v1160_v10 }
 0x14f   :  { %v434_v12 = vadd.f32 %v1284_v20, %v433_v11 }
 0x151   :  { %v556_v14 = vmax.f32 %v434_v12, 0.0  ;;  %v457_v12 = vadd.f32 %v1284_v20, %v456_v38  ;;  %v467_v38 = vadd.f32 %v1284_v20, %v466_v2 }
 0x152   :  { %v724_v15 = vpop.f32.mrf.mxu1 }
 0x153   :  { %v607_v16 = vpack.c.bf16 %v556_v14, %v555_v13  ;;  %v725_v17 = vadd.f32 %v1352_v28, %v724_v15  ;;  %v459_v13 = vadd.f32 %v1284_v20, %v458_v46 }
 0x155   :  { %872 = vst [vmem:[%s1709_s5 + $0x40] sm:$0xff] %v725_v17  ;;  %763 = vmatmul.bf16.gmra.mxu1 %v607_v16  ;;  %v471_v15 = vpop.f32.mrf.mxu3  ;;  %v565_v16 = vmax.f32 %v457_v12, 0.0  ;;  %v566_v17 = vmax.f32 %v459_v13, 0.0 }
 0x156   :  { %v436_v18 = vpop.f32.mrf.mxu0 }
 0x157   :  { %v437_v23 = vadd.f32 %v1284_v20, %v436_v18 }
 0x159   :  { %v557_v26 = vmax.f32 %v437_v23, 0.0  ;;  %v1161_v23 = vld [vmem:[%s1706_s0 + $0xe8] sm:$0xff] }
 0x15a   :  { %v726_v21 = vpop.f32.mrf.mxu1 }
 0x15b   :  { %v727_v22 = vadd.f32 %v1352_v28, %v726_v21  ;;  %v612_v21 = vpack.c.bf16 %v566_v17, %v565_v16 }
 0x15d   :  { %873 = vst [vmem:[%s1709_s5 + $0x48] sm:$0xff] %v727_v22  ;;  %v473_v22 = vpop.f32.mrf.mxu3 }
 0x15e   :  { %v438_v24 = vpop.f32.mrf.mxu0  ;;  %1097 = vmatmul.msk.bf16.gmra.mxu3 %vm265_vm0, %v1161_v23 }
 0x15f   :  { %v439_v25 = vadd.f32 %v1284_v20, %v438_v24 }
 0x161   :  { %v558_v27 = vmax.f32 %v439_v25, 0.0  ;;  %v462_v25 = vadd.f32 %v1284_v20, %v461_v52 }
 0x162   :  { %v729_v29 = vpop.f32.mrf.mxu1 }
 0x163   :  { %v608_v30 = vpack.c.bf16 %v558_v27, %v557_v26  ;;  %v730_v31 = vadd.f32 %v1352_v28, %v729_v29  ;;  %v464_v26 = vadd.f32 %v1284_v20, %v463_v60 }
 0x165   :  { %874 = vst [vmem:[%s1709_s5 + $0x50] sm:$0xff] %v730_v31  ;;  %768 = vmatmul.bf16.gmra.mxu1 %v608_v30  ;;  %v476_v29 = vpop.f32.mrf.mxu3  ;;  %v567_v30 = vmax.f32 %v462_v25, 0.0  ;;  %v568_v31 = vmax.f32 %v464_v26, 0.0 }
 0x166   :  { %v441_v32 = vpop.f32.mrf.mxu0  ;;  %v477_v61 = vadd.f32 %v1284_v20, %v476_v29 }
 0x167   :  { %v442_v36 = vadd.f32 %v1284_v20, %v441_v32 }
 0x169   :  { %v559_v40 = vmax.f32 %v442_v36, 0.0  ;;  %v1162_v36 = vld [vmem:[%s1706_s0 + $0xf0] sm:$0xff] }
 0x16a   :  { %v731_v34 = vpop.f32.mrf.mxu1 }
 0x16b   :  { %v732_v35 = vadd.f32 %v1352_v28, %v731_v34  ;;  %v613_v34 = vpack.c.bf16 %v568_v31, %v567_v30 }
 0x16d   :  { %875 = vst [vmem:[%s1709_s5 + $0x58] sm:$0xff] %v732_v35  ;;  %v478_v35 = vpop.f32.mrf.mxu3 }
 0x16e   :  { %v443_v37 = vpop.f32.mrf.mxu0  ;;  %1098 = vmatmul.msk.bf16.gmra.mxu3 %vm265_vm0, %v1162_v36 }
 0x16f   :  { %v444_v39 = vadd.f32 %v1284_v20, %v443_v37 }
 0x171   :  { %v560_v41 = vmax.f32 %v444_v39, 0.0  ;;  %v469_v39 = vadd.f32 %v1284_v20, %v468_v9 }
 0x172   :  { %v734_v42 = vpop.f32.mrf.mxu1 }
 0x173   :  { %v609_v43 = vpack.c.bf16 %v560_v41, %v559_v40  ;;  %v735_v44 = vadd.f32 %v1352_v28, %v734_v42  ;;  %v569_v42 = vmax.f32 %v467_v38, 0.0 }
 0x175   :  { %876 = vst [vmem:[%s1709_s5 + $0x60] sm:$0xff] %v735_v44  ;;  %773 = vmatmul.bf16.gmra.mxu1 %v609_v43  ;;  %v481_v41 = vpop.f32.mrf.mxu3  ;;  %v570_v43 = vmax.f32 %v469_v39, 0.0 }
 0x176   :  { %v446_v45 = vpop.f32.mrf.mxu0 }
 0x177   :  { %v447_v50 = vadd.f32 %v1284_v20, %v446_v45  ;;  %v614_v46 = vpack.c.bf16 %v570_v43, %v569_v42 }
 0x179   :  { %v561_v54 = vmax.f32 %v447_v50, 0.0  ;;  %v472_v50 = vadd.f32 %v1284_v20, %v471_v15 }
 0x17a   :  { %v736_v48 = vpop.f32.mrf.mxu1 }
 0x17b   :  { %v737_v49 = vadd.f32 %v1352_v28, %v736_v48  ;;  %v1163_v48 = vld [vmem:[%s1706_s0 + $0xf8] sm:$0xff] }
 0x17d   :  { %877 = vst [vmem:[%s1709_s5 + $0x68] sm:$0xff] %v737_v49  ;;  %v483_v47 = vpop.f32.mrf.mxu3 }
 0x17e   :  { %v448_v51 = vpop.f32.mrf.mxu0  ;;  %1099 = vmatmul.msk.bf16.gmra.mxu3 %vm265_vm0, %v1163_v48 }
 0x17f   :  { %v449_v53 = vadd.f32 %v1284_v20, %v448_v51  ;;  %v474_v51 = vadd.f32 %v1284_v20, %v473_v22 }
 0x181   :  { %v562_v55 = vmax.f32 %v449_v53, 0.0 }
 0x182   :  { %v739_v56 = vpop.f32.mrf.mxu1 }
 0x183   :  { %v610_v57 = vpack.c.bf16 %v562_v55, %v561_v54  ;;  %v740_v58 = vadd.f32 %v1352_v28, %v739_v56  ;;  %v571_v54 = vmax.f32 %v472_v50, 0.0  ;;  %v572_v55 = vmax.f32 %v474_v51, 0.0 }
 0x185   :  { %878 = vst [vmem:[%s1709_s5 + $0x70] sm:$0xff] %v740_v58  ;;  %778 = vmatmul.bf16.gmra.mxu1 %v610_v57  ;;  %v486_v53 = vpop.f32.mrf.mxu3  ;;  %v615_v58 = vpack.c.bf16 %v572_v55, %v571_v54 }
 0x186   :  { %v451_v59 = vpop.f32.mrf.mxu0 }
 0x187   :  { %v452_v0 = vadd.f32 %v1284_v20, %v451_v59 }
 0x189   :  { %v563_v4 = vmax.f32 %v452_v0, 0.0  ;;  %v573_v0 = vmax.f32 %v477_v61, 0.0 }
 0x18a   :  { %v741_v62 = vpop.f32.mrf.mxu1 }
 0x18b   :  { %v742_v63 = vadd.f32 %v1352_v28, %v741_v62  ;;  %v479_v62 = vadd.f32 %v1284_v20, %v478_v35 }
 0x18d   :  { %879 = vst [vmem:[%s1709_s5 + $0x78] sm:$0xff] %v742_v63  ;;  %v488_v59 = vpop.f32.mrf.mxu3 }
 0x18e   :  { %v453_v1 = vpop.f32.mrf.mxu0 }
 0x18f   :  { %v454_v3 = vadd.f32 %v1284_v20, %v453_v1  ;;  %v574_v1 = vmax.f32 %v479_v62, 0.0 }
 0x191   :  { %v564_v5 = vmax.f32 %v454_v3, 0.0 }
 0x192   :  { %v744_v6 = vpop.f32.mrf.mxu1 }
 0x193   :  { %v745_v7 = vadd.f32 %v1352_v28, %v744_v6  ;;  %v611_v8 = vpack.c.bf16 %v564_v5, %v563_v4  ;;  %v616_v5 = vpack.c.bf16 %v574_v1, %v573_v0 }
 0x195   :  { %880 = vst [vmem:[%s1709_s5 + $0x80] sm:$0xff] %v745_v7  ;;  %783 = vmatmul.bf16.vlgmr.msra.gmra.mxu2 %v611_v8  ;;  %v491_v3 = vpop.f32.mrf.mxu3  ;;  %v482_v7 = vadd.f32 %v1284_v20, %v481_v41  ;;  %v484_v8 = vadd.f32 %v1284_v20, %v483_v47 }
 0x196   :  { %v492_v31 = vadd.f32 %v1284_v20, %v491_v3 }
 0x197   :  { %v576_v12 = vmax.f32 %v484_v8, 0.0 }
 0x19a   :  { %v746_v11 = vpop.f32.mrf.mxu1 }
 0x19b   :  { %v747_v14 = vadd.f32 %v1352_v28, %v746_v11  ;;  %v575_v11 = vmax.f32 %v482_v7, 0.0 }
 0x19d   :  { %881 = vst [vmem:[%s1709_s5 + $0x88] sm:$0xff] %v747_v14  ;;  %v493_v10 = vpop.f32.mrf.mxu3  ;;  %v617_v15 = vpack.c.bf16 %v576_v12, %v575_v11 }
 0x1a2   :  { %v749_v18 = vpop.f32.mrf.mxu1 }
 0x1a3   :  { %v750_v19 = vadd.f32 %v1352_v28, %v749_v18  ;;  %v487_v18 = vadd.f32 %v1284_v20, %v486_v53 }
 0x1a5   :  { %882 = vst [vmem:[%s1709_s5 + $0x90] sm:$0xff] %v750_v19  ;;  %788 = vmatmul.bf16.gmra.mxu2 %v612_v21  ;;  %v496_v16 = vpop.f32.mrf.mxu3  ;;  %v489_v19 = vadd.f32 %v1284_v20, %v488_v59  ;;  %v577_v22 = vmax.f32 %v487_v18, 0.0 }
 0x1a7   :  { %v578_v23 = vmax.f32 %v489_v19, 0.0 }
 0x1aa   :  { %v751_v24 = vpop.f32.mrf.mxu1 }
 0x1ab   :  { %v752_v27 = vadd.f32 %v1352_v28, %v751_v24 }
 0x1ad   :  { %883 = vst [vmem:[%s1709_s5 + $0x98] sm:$0xff] %v752_v27  ;;  %v498_v24 = vpop.f32.mrf.mxu3  ;;  %v618_v27 = vpack.c.bf16 %v578_v23, %v577_v22 }
 0x1ae   :  { %v499_v41 = vadd.f32 %v1284_v20, %v498_v24 }
 0x1b2   :  { %v754_v32 = vpop.f32.mrf.mxu1 }
 0x1b3   :  { %v755_v33 = vadd.f32 %v1352_v28, %v754_v32  ;;  %v494_v32 = vadd.f32 %v1284_v20, %v493_v10 }
 0x1b5   :  { %884 = vst [vmem:[%s1709_s5 + $0xa0] sm:$0xff] %v755_v33  ;;  %793 = vmatmul.bf16.gmra.mxu2 %v613_v34  ;;  %v501_v30 = vpop.f32.mrf.mxu3  ;;  %v579_v34 = vmax.f32 %v492_v31, 0.0  ;;  %v580_v35 = vmax.f32 %v494_v32, 0.0 }
 0x1b6   :  { %v502_v51 = vadd.f32 %v1284_v20, %v501_v30 }
 0x1b7   :  { %v619_v36 = vpack.c.bf16 %v580_v35, %v579_v34 }
 0x1b8   :  { %v583_v53 = vmax.f32 %v502_v51, 0.0 }
 0x1ba   :  { %v756_v37 = vpop.f32.mrf.mxu1 }
 0x1bb   :  { %v757_v40 = vadd.f32 %v1352_v28, %v756_v37 }
 0x1bd   :  { %885 = vst [vmem:[%s1709_s5 + $0xa8] sm:$0xff] %v757_v40  ;;  %v503_v37 = vpop.f32.mrf.mxu3  ;;  %v497_v40 = vadd.f32 %v1284_v20, %v496_v16 }
 0x1bf   :  { %v581_v43 = vmax.f32 %v497_v40, 0.0 }
 0x1c2   :  { %v759_v44 = vpop.f32.mrf.mxu1 }
 0x1c3   :  { %v760_v45 = vadd.f32 %v1352_v28, %v759_v44  ;;  %v582_v44 = vmax.f32 %v499_v41, 0.0 }
 0x1c5   :  { %886 = vst [vmem:[%s1709_s5 + $0xb0] sm:$0xff] %v760_v45  ;;  %798 = vmatmul.bf16.gmra.mxu2 %v614_v46  ;;  %v506_v42 = vpop.f32.mrf.mxu3  ;;  %v620_v47 = vpack.c.bf16 %v582_v44, %v581_v43 }
 0x1c6   :  { %v507_v61 = vadd.f32 %v1284_v20, %v506_v42 }
 0x1c8   :  { %v585_v0 = vmax.f32 %v507_v61, 0.0 }
 0x1ca   :  { %v761_v49 = vpop.f32.mrf.mxu1 }
 0x1cb   :  { %v762_v52 = vadd.f32 %v1352_v28, %v761_v49 }
 0x1cd   :  { %887 = vst [vmem:[%s1709_s5 + $0xb8] sm:$0xff] %v762_v52  ;;  %v508_v49 = vpop.f32.mrf.mxu3  ;;  %v504_v52 = vadd.f32 %v1284_v20, %v503_v37 }
 0x1ce   :  { %v509_v62 = vadd.f32 %v1284_v20, %v508_v49 }
 0x1cf   :  { %v584_v54 = vmax.f32 %v504_v52, 0.0 }
 0x1d0   :  { %v586_v1 = vmax.f32 %v509_v62, 0.0 }
 0x1d2   :  { %v764_v56 = vpop.f32.mrf.mxu1 }
 0x1d3   :  { %v765_v57 = vadd.f32 %v1352_v28, %v764_v56 }
 0x1d5   :  { %888 = vst [vmem:[%s1709_s5 + $0xc0] sm:$0xff] %v765_v57  ;;  %803 = vmatmul.bf16.gmra.mxu2 %v615_v58  ;;  %v511_v57 = vpop.f32.mrf.mxu3  ;;  %v621_v58 = vpack.c.bf16 %v584_v54, %v583_v53 }
 0x1d6   :  { %v512_v8 = vadd.f32 %v1284_v20, %v511_v57 }
 0x1d8   :  { %v587_v10 = vmax.f32 %v512_v8, 0.0 }
 0x1da   :  { %v766_v60 = vpop.f32.mrf.mxu1 }
 0x1db   :  { %v767_v63 = vadd.f32 %v1352_v28, %v766_v60 }
 0x1dd   :  { %889 = vst [vmem:[%s1709_s5 + $0xc8] sm:$0xff] %v767_v63  ;;  %v513_v63 = vpop.f32.mrf.mxu3 }
 0x1e2   :  { %v769_v2 = vpop.f32.mrf.mxu1 }
 0x1e3   :  { %v770_v4 = vadd.f32 %v1352_v28, %v769_v2 }
 0x1e5   :  { %890 = vst [vmem:[%s1709_s5 + $0xd0] sm:$0xff] %v770_v4  ;;  %808 = vmatmul.bf16.gmra.mxu2 %v616_v5  ;;  %v622_v4 = vpack.c.bf16 %v586_v1, %v585_v0  ;;  %v516_v5 = vpop.f32.mrf.mxu3 }
 0x1e6   :  { %v517_v19 = vadd.f32 %v1284_v20, %v516_v5 }
 0x1e8   :  { %v589_v22 = vmax.f32 %v517_v19, 0.0 }
 0x1ea   :  { %v771_v6 = vpop.f32.mrf.mxu1 }
 0x1eb   :  { %v772_v9 = vadd.f32 %v1352_v28, %v771_v6 }
 0x1ed   :  { %891 = vst [vmem:[%s1709_s5 + $0xd8] sm:$0xff] %v772_v9  ;;  %v514_v9 = vadd.f32 %v1284_v20, %v513_v63 }
 0x1ef   :  { %v588_v11 = vmax.f32 %v514_v9, 0.0 }
 0x1f2   :  { %v774_v13 = vpop.f32.mrf.mxu1 }
 0x1f3   :  { %v775_v14 = vadd.f32 %v1352_v28, %v774_v13  ;;  %v518_v13 = vpop.f32.mrf.mxu3 }
 0x1f5   :  { %892 = vst [vmem:[%s1709_s5 + $0xe0] sm:$0xff] %v775_v14  ;;  %813 = vmatmul.bf16.gmra.mxu2 %v617_v15  ;;  %v623_v15 = vpack.c.bf16 %v588_v11, %v587_v10 }
 0x1fa   :  { %v776_v17 = vpop.f32.mrf.mxu1 }
 0x1fb   :  { %v777_v21 = vadd.f32 %v1352_v28, %v776_v17  ;;  %v521_v18 = vpop.f32.mrf.mxu3 }
 0x1fc   :  { %v522_v31 = vadd.f32 %v1284_v20, %v521_v18 }
 0x1fd   :  { %893 = vst [vmem:[%s1709_s5 + $0xe8] sm:$0xff] %v777_v21  ;;  %v519_v21 = vadd.f32 %v1284_v20, %v518_v13 }
 0x1fe   :  { %v591_v34 = vmax.f32 %v522_v31, 0.0 }
 0x1ff   :  { %v590_v23 = vmax.f32 %v519_v21, 0.0 }
 0x202   :  { %v779_v25 = vpop.f32.mrf.mxu1 }
 0x203   :  { %v780_v26 = vadd.f32 %v1352_v28, %v779_v25 }
 0x205   :  { %894 = vst [vmem:[%s1709_s5 + $0xf0] sm:$0xff] %v780_v26  ;;  %818 = vmatmul.bf16.gmra.mxu2 %v618_v27  ;;  %v624_v26 = vpack.c.bf16 %v590_v23, %v589_v22  ;;  %v523_v27 = vpop.f32.mrf.mxu3 }
 0x206   :  { %v524_v32 = vadd.f32 %v1284_v20, %v523_v27 }
 0x208   :  { %v592_v35 = vmax.f32 %v524_v32, 0.0 }
 0x20a   :  { %v781_v29 = vpop.f32.mrf.mxu1 }
 0x20b   :  { %v782_v33 = vadd.f32 %v1352_v28, %v781_v29 }
 0x20d   :  { %895 = vst [vmem:[%s1709_s5 + $0xf8] sm:$0xff] %v782_v33  ;;  %v526_v33 = vpop.f32.mrf.mxu3 }
 0x20e   :  { %v527_v42 = vadd.f32 %v1284_v20, %v526_v33 }
 0x210   :  { %v593_v44 = vmax.f32 %v527_v42, 0.0 }
 0x215   :  { %823 = vmatmul.bf16.gmra.mxu2 %v619_v36 }
 0x218   :  { %v784_v38 = vpop.f32.mrf.mxu2 }
 0x219   :  { %v785_v39 = vadd.f32 %v1352_v28, %v784_v38  ;;  %v625_v38 = vpack.c.bf16 %v592_v35, %v591_v34 }
 0x21b   :  { %896 = vst [vmem:[%s1709_s5 + $0x100] sm:$0xff] %v785_v39  ;;  %v528_v39 = vpop.f32.mrf.mxu3 }
 0x21c   :  { %v529_v43 = vadd.f32 %v1284_v20, %v528_v39 }
 0x220   :  { %v786_v45 = vpop.f32.mrf.mxu2 }
 0x221   :  { %v787_v46 = vadd.f32 %v1352_v28, %v786_v45  ;;  %v594_v45 = vmax.f32 %v529_v43, 0.0 }
 0x223   :  { %897 = vst [vmem:[%s1709_s5 + $0x108] sm:$0xff] %v787_v46 }
 0x225   :  { %828 = vmatmul.bf16.gmra.mxu2 %v620_v47 }
 0x228   :  { %v789_v48 = vpop.f32.mrf.mxu2 }
 0x229   :  { %v790_v50 = vadd.f32 %v1352_v28, %v789_v48  ;;  %v626_v48 = vpack.c.bf16 %v594_v45, %v593_v44 }
 0x22b   :  { %898 = vst [vmem:[%s1709_s5 + $0x110] sm:$0xff] %v790_v50 }
 0x230   :  { %v791_v55 = vpop.f32.mrf.mxu2 }
 0x231   :  { %v792_v56 = vadd.f32 %v1352_v28, %v791_v55 }
 0x233   :  { %899 = vst [vmem:[%s1709_s5 + $0x118] sm:$0xff] %v792_v56 }
 0x235   :  { %833 = vmatmul.bf16.gmra.mxu2 %v621_v58 }
 0x238   :  { %v794_v59 = vpop.f32.mrf.mxu2 }
 0x239   :  { %v795_v60 = vadd.f32 %v1352_v28, %v794_v59 }
 0x23b   :  { %900 = vst [vmem:[%s1709_s5 + $0x120] sm:$0xff] %v795_v60 }
 0x240   :  { %v796_v2 = vpop.f32.mrf.mxu2 }
 0x241   :  { %v797_v3 = vadd.f32 %v1352_v28, %v796_v2 }
 0x243   :  { %901 = vst [vmem:[%s1709_s5 + $0x128] sm:$0xff] %v797_v3 }
 0x245   :  { %838 = vmatmul.bf16.gmra.mxu2 %v622_v4 }
 0x248   :  { %v799_v6 = vpop.f32.mrf.mxu2 }
 0x249   :  { %v800_v7 = vadd.f32 %v1352_v28, %v799_v6 }
 0x24b   :  { %902 = vst [vmem:[%s1709_s5 + $0x130] sm:$0xff] %v800_v7 }
 0x250   :  { %v801_v12 = vpop.f32.mrf.mxu2 }
 0x251   :  { %v802_v14 = vadd.f32 %v1352_v28, %v801_v12 }
 0x253   :  { %903 = vst [vmem:[%s1709_s5 + $0x138] sm:$0xff] %v802_v14 }
 0x255   :  { %843 = vmatmul.bf16.gmra.mxu2 %v623_v15 }
 0x258   :  { %v804_v16 = vpop.f32.mrf.mxu2 }
 0x259   :  { %v805_v17 = vadd.f32 %v1352_v28, %v804_v16 }
 0x25b   :  { %904 = vst [vmem:[%s1709_s5 + $0x140] sm:$0xff] %v805_v17 }
 0x260   :  { %v806_v24 = vpop.f32.mrf.mxu2 }
 0x261   :  { %v807_v25 = vadd.f32 %v1352_v28, %v806_v24 }
 0x263   :  { %905 = vst [vmem:[%s1709_s5 + $0x148] sm:$0xff] %v807_v25 }
 0x265   :  { %848 = vmatmul.bf16.gmra.mxu2 %v624_v26 }
 0x268   :  { %v809_v29 = vpop.f32.mrf.mxu2 }
 0x269   :  { %v810_v30 = vadd.f32 %v1352_v28, %v809_v29 }
 0x26b   :  { %906 = vst [vmem:[%s1709_s5 + $0x150] sm:$0xff] %v810_v30 }
 0x270   :  { %v811_v36 = vpop.f32.mrf.mxu2 }
 0x271   :  { %v812_v37 = vadd.f32 %v1352_v28, %v811_v36 }
 0x273   :  { %907 = vst [vmem:[%s1709_s5 + $0x158] sm:$0xff] %v812_v37 }
 0x275   :  { %853 = vmatmul.bf16.gmra.mxu2 %v625_v38 }
 0x278   :  { %v814_v40 = vpop.f32.mrf.mxu2 }
 0x279   :  { %v815_v41 = vadd.f32 %v1352_v28, %v814_v40 }
 0x27b   :  { %908 = vst [vmem:[%s1709_s5 + $0x160] sm:$0xff] %v815_v41 }
 0x280   :  { %v816_v46 = vpop.f32.mrf.mxu2 }
 0x281   :  { %v817_v47 = vadd.f32 %v1352_v28, %v816_v46 }
 0x283   :  { %909 = vst [vmem:[%s1709_s5 + $0x168] sm:$0xff] %v817_v47 }
 0x285   :  { %858 = vmatmul.bf16.gmra.mxu2 %v626_v48 }
 0x288   :  { %v819_v49 = vpop.f32.mrf.mxu2 }
 0x289   :  { %v820_v50 = vadd.f32 %v1352_v28, %v819_v49 }
 0x28b   :  { %910 = vst [vmem:[%s1709_s5 + $0x170] sm:$0xff] %v820_v50 }
 0x290   :  { %v821_v20 = vpop.f32.mrf.mxu2 }
 0x291   :  { %v822_v51 = vadd.f32 %v1352_v28, %v821_v20 }
 0x293   :  { %911 = vst [vmem:[%s1709_s5 + $0x178] sm:$0xff] %v822_v51 }
 0x298   :  { %v824_v52 = vpop.f32.mrf.mxu2 }
 0x299   :  { %v825_v53 = vadd.f32 %v1352_v28, %v824_v52 }
 0x29b   :  { %912 = vst [vmem:[%s1709_s5 + $0x180] sm:$0xff] %v825_v53 }
 0x2a0   :  { %v826_v54 = vpop.f32.mrf.mxu2 }
 0x2a1   :  { %v827_v55 = vadd.f32 %v1352_v28, %v826_v54 }
 0x2a3   :  { %913 = vst [vmem:[%s1709_s5 + $0x188] sm:$0xff] %v827_v55 }
 0x2a8   :  { %v829_v56 = vpop.f32.mrf.mxu2 }
 0x2a9   :  { %v830_v57 = vadd.f32 %v1352_v28, %v829_v56 }
 0x2ab   :  { %914 = vst [vmem:[%s1709_s5 + $0x190] sm:$0xff] %v830_v57 }
 0x2b0   :  { %v831_v58 = vpop.f32.mrf.mxu2 }
 0x2b1   :  { %v832_v59 = vadd.f32 %v1352_v28, %v831_v58 }
 0x2b3   :  { %915 = vst [vmem:[%s1709_s5 + $0x198] sm:$0xff] %v832_v59 }
 0x2b8   :  { %v834_v60 = vpop.f32.mrf.mxu2 }
 0x2b9   :  { %v835_v61 = vadd.f32 %v1352_v28, %v834_v60 }
 0x2bb   :  { %916 = vst [vmem:[%s1709_s5 + $0x1a0] sm:$0xff] %v835_v61 }
 0x2c0   :  { %v836_v62 = vpop.f32.mrf.mxu2 }
 0x2c1   :  { %v837_v63 = vadd.f32 %v1352_v28, %v836_v62 }
 0x2c3   :  { %917 = vst [vmem:[%s1709_s5 + $0x1a8] sm:$0xff] %v837_v63 }
 0x2c8   :  { %v839_v0 = vpop.f32.mrf.mxu2 }
 0x2c9   :  { %v840_v1 = vadd.f32 %v1352_v28, %v839_v0 }
 0x2cb   :  { %918 = vst [vmem:[%s1709_s5 + $0x1b0] sm:$0xff] %v840_v1 }
 0x2d0   :  { %v841_v2 = vpop.f32.mrf.mxu2 }
 0x2d1   :  { %v842_v3 = vadd.f32 %v1352_v28, %v841_v2 }
 0x2d3   :  { %919 = vst [vmem:[%s1709_s5 + $0x1b8] sm:$0xff] %v842_v3 }
 0x2d8   :  { %v844_v4 = vpop.f32.mrf.mxu2 }
 0x2d9   :  { %v845_v5 = vadd.f32 %v1352_v28, %v844_v4 }
 0x2db   :  { %920 = vst [vmem:[%s1709_s5 + $0x1c0] sm:$0xff] %v845_v5 }
 0x2e0   :  { %v846_v6 = vpop.f32.mrf.mxu2 }
 0x2e1   :  { %v847_v7 = vadd.f32 %v1352_v28, %v846_v6 }
 0x2e3   :  { %921 = vst [vmem:[%s1709_s5 + $0x1c8] sm:$0xff] %v847_v7 }
 0x2e8   :  { %v849_v8 = vpop.f32.mrf.mxu2 }
 0x2e9   :  { %v850_v9 = vadd.f32 %v1352_v28, %v849_v8 }
 0x2eb   :  { %922 = vst [vmem:[%s1709_s5 + $0x1d0] sm:$0xff] %v850_v9 }
 0x2f0   :  { %v851_v10 = vpop.f32.mrf.mxu2 }
 0x2f1   :  { %v852_v11 = vadd.f32 %v1352_v28, %v851_v10 }
 0x2f3   :  { %923 = vst [vmem:[%s1709_s5 + $0x1d8] sm:$0xff] %v852_v11 }
 0x2f8   :  { %v854_v12 = vpop.f32.mrf.mxu2 }
 0x2f9   :  { %v855_v13 = vadd.f32 %v1352_v28, %v854_v12 }
 0x2fb   :  { %924 = vst [vmem:[%s1709_s5 + $0x1e0] sm:$0xff] %v855_v13 }
 0x300   :  { %v856_v14 = vpop.f32.mrf.mxu2 }
 0x301   :  { %v857_v15 = vadd.f32 %v1352_v28, %v856_v14 }
 0x303   :  { %925 = vst [vmem:[%s1709_s5 + $0x1e8] sm:$0xff] %v857_v15 }
 0x308   :  { %v859_v16 = vpop.f32.mrf.mxu2 }
 0x309   :  { %v860_v17 = vadd.f32 %v1352_v28, %v859_v16 }
 0x30b   :  { %926 = vst [vmem:[%s1709_s5 + $0x1f0] sm:$0xff] %v860_v17 }
 0x310   :  { %v861_v18 = vpop.f32.mrf.mxu2 }
 0x311   :  { %v862_v19 = vadd.f32 %v1352_v28, %v861_v18 }
 0x313   :  { %927 = vst [vmem:[%s1709_s5 + $0x1f8] sm:$0xff] %v862_v19 }

</bundles_post_ra>
